<compile_context>
chip_gen: v7x
topology: tpu7x:2x2x1
jax: 0.10.0
libtpu: 0.0.40
codegen_flags: <defaults>
</compile_context>

<pallas_src>
import math

import jax
import jax.numpy as jnp
from jax import lax
from jax.experimental import pallas as pl
from jax.experimental.pallas import tpu as pltpu

# ---------------- config (small, consistent with the module) ----------------
D_MODEL = 32
D_INNER = 64                       # expand = 2
D_STATE = 16
D_CONV = 4
DT_RANK = math.ceil(D_MODEL / 16)  # = 2
BATCH = 2
SEQ = 8
EPS = 1e-5                         # RMSNorm eps
DT_MIN, DT_MAX, DT_INIT_FLOOR = 1e-3, 0.1, 1e-4
# config.bias = False, config.conv_bias = True, config.pscan = False (seq scan)


def _batch_per_grid_step(batch):
    """How many batch elements one grid step handles.

    Single-TensorCore chips (v5e / v6e): fold the whole batch into one grid
    step (per-step pipeline overhead ~0.35us is comparable to the compute at
    these shapes).  Multi-TC chips (v4 / v5p / v7x): keep a parallel batch
    grid so batch elements land on different TensorCores.
    """
    try:
        kind = jax.devices()[0].device_kind.lower()
    except Exception:
        return 1
    single_tc = any(t in kind for t in
                    ("v5 lite", "v5e", "v5lite", "v6 lite", "v6e", "v6lite"))
    return batch if single_tc else 1


# ------------------------------ Pallas kernel -------------------------------
def _residual_mamba_kernel(
    x_ref,      # (NB*L, D)   flattened input block (NB batch elements)
    w_in_ref,   # (D, 2E)     fused in_proj weight (x half | z half), transposed
    p_ref,      # (184, E)    packed 64-lane params:
                #   rows [0,E)        : w_dtc   (E,E)   x_proj(delta) o dt_proj folded
                #   rows [E,2E)       : w_out   (E,D)   out_proj^T, lanes [0,D)
                #   rows [2E,2E+2N)   : w_bc    (2N,E)  x_proj rows for B and C
                #   rows [.. , ..+N)  : A_T     (N,E)   -exp(A_log)^T (pre-computed)
                #   rows last K+4     : conv_w (K) | conv_b | dt_b | D | [norm_w,0]
    o_ref,      # (NB*L, D)   output block
):
    RT, D = x_ref.shape
    L = SEQ
    NB = RT // L
    E = D_INNER
    N = D_STATE
    K = D_CONV

    # -------- hoisted, grid-invariant parameter loads / unpacking --------
    w_in = w_in_ref[...]                              # (D, 2E)
    P = p_ref[...]                                    # (184, E)
    w_dtc = P[0:E, :]                                 # (E, E)
    w_out = P[E:2 * E, 0:D]                           # (E, D)
    w_bc = P[2 * E:2 * E + 2 * N, :]                  # (2N, E)
    A_T = P[2 * E + 2 * N:2 * E + 3 * N, :]           # (N, E)  = -exp(A_log)^T
    vec = P[2 * E + 3 * N:2 * E + 3 * N + K + 4, :]   # (K+4, E)
    w_conv = vec[0:K, :]                              # (K, E)  depthwise taps
    conv_b = vec[K:K + 1, :]                          # (1, E)
    dt_b = vec[K + 1:K + 2, :]                        # (1, E)
    D_vec = vec[K + 2:K + 3, :]                       # (1, E)
    norm_w = vec[K + 3:K + 4, 0:D]                    # (1, D)

    x = x_ref[...]                                    # (NB*L, D)

    # ---- RMSNorm (whole flattened batch at once) ----
    ms = jnp.mean(x * x, axis=-1, keepdims=True)
    xn = x * lax.rsqrt(ms + EPS) * norm_w             # (NB*L, D)

    # ---- fused in_proj: one (NB*L, 2E) matmul (lane-dense 128 wide) ----
    xz = jnp.dot(xn, w_in, preferred_element_type=jnp.float32)   # (NB*L, 2E)
    xs_all = xz[:, :E]
    z_all = xz[:, E:]

    # ---- causal depthwise conv1d over time (per batch element) ----
    # one zero-pad + K static shifted slices; row slices are tile-aligned (L=8)
    xc_rows = []
    for nb in range(NB):
        xs = xs_all[nb * L:(nb + 1) * L, :]                       # (L, E)
        xs_pad = jnp.concatenate(
            [jnp.zeros((K - 1, E), jnp.float32), xs], axis=0)     # (L+K-1, E)
        acc = conv_b
        for k in range(K):
            acc = acc + w_conv[k:k + 1, :] * xs_pad[k:k + L, :]
        xc_rows.append(acc)
    xc_all = jax.nn.silu(jnp.concatenate(xc_rows, axis=0))        # (NB*L, E)

    # ---- delta: x_proj(delta-rows) o dt_proj folded into one (E,E) matmul ----
    delta_all = jax.nn.softplus(
        jnp.dot(xc_all, w_dtc, preferred_element_type=jnp.float32) + dt_b)

    # ---- B, C produced directly transposed: (2N, NB*L), contract over E ----
    bct_all = lax.dot_general(w_bc, xc_all, (((1,), (1,)), ((), ())),
                              preferred_element_type=jnp.float32)  # (2N, NB*L)

    dxc_all = delta_all * xc_all                                   # (NB*L, E)

    # ---- selective scan: fully unrolled, state (N, E) stays in vregs,
    #      C-contraction and D*x fused (no hs / no (L,E,N) tensors) ----
    y_rows = []
    for nb in range(NB):
        delta = delta_all[nb * L:(nb + 1) * L, :]                  # (L, E)
        dxc = dxc_all[nb * L:(nb + 1) * L, :]                      # (L, E)
        xc = xc_all[nb * L:(nb + 1) * L, :]                        # (L, E)
        BmT = bct_all[0:N, nb * L:(nb + 1) * L]                    # (N, L)
        CmT = bct_all[N:2 * N, nb * L:(nb + 1) * L]                # (N, L)

        h = jnp.zeros((N, E), jnp.float32)
        ys = []
        for t in range(L):
            dA_t = jnp.exp(delta[t:t + 1, :] * A_T)                # (N, E)
            h = dA_t * h + BmT[:, t:t + 1] * dxc[t:t + 1, :]       # (N, E)
            ys.append(jnp.sum(CmT[:, t:t + 1] * h, axis=0, keepdims=True))
        y_rows.append(jnp.concatenate(ys, axis=0) + D_vec * xc)    # (L, E)
    y_all = jnp.concatenate(y_rows, axis=0)                        # (NB*L, E)

    # ---- gate, out_proj, residual (whole flattened batch) ----
    out = jnp.dot(y_all * jax.nn.silu(z_all), w_out,
                  preferred_element_type=jnp.float32)              # (NB*L, D)
    o_ref[...] = out + x


# ------------------------------- wrapper -------------------------------------
def residual_block_pallas(x, params):
    B, L, D = x.shape
    E, N, K, R = D_INNER, D_STATE, D_CONV, DT_RANK

    # 128-lane weight (kept separate, fully lane-dense)
    w_in = params["in_proj_w"].T                                  # (D, 2E)

    # Fold the (linear) delta path: x_proj delta-rows followed by dt_proj.
    # delta_lin = xc @ (x_proj_w[:R].T @ dt_proj_w.T) + dt_b  (exact algebra).
    w_dtc = jnp.matmul(params["x_proj_w"][:R].T, params["dt_proj_w"].T,
                       precision=lax.Precision.HIGHEST)           # (E, E)
    w_out_pad = jnp.zeros((E, E), jnp.float32).at[:, :D].set(
        params["out_proj_w"].T)                                   # (E, E), data in [0,D)
    w_bc = params["x_proj_w"][R:]                                 # (2N, E)
    a_T = (-jnp.exp(params["A_log"])).T                           # (N, E)  precomputed

    conv_w = params["conv_w"][:, 0, :].T                          # (K, E), tap-major
    norm_row = jnp.zeros((1, E), jnp.float32).at[0, :D].set(params["norm_w"])
    vec = jnp.concatenate([
        conv_w,                               # rows [0, K)
        params["conv_b"][None, :],            # row K
        params["dt_proj_b"][None, :],         # row K+1
        params["D"][None, :],                 # row K+2
        norm_row,                             # row K+3 (norm_w in lanes [0, D))
    ], axis=0)                                # (K+4, E)

    # single packed 64-lane parameter buffer -> one DMA
    p_packed = jnp.concatenate([w_dtc, w_out_pad, w_bc, a_T, vec], axis=0)
    PR = 2 * E + 3 * N + K + 4                # = 184 rows

    nb = _batch_per_grid_step(B)
    grid = (B // nb,)

    x_flat = x.reshape(B * L, D)              # free (row-major contiguous)

    out_flat = pl.pallas_call(
        _residual_mamba_kernel,
        out_shape=jax.ShapeDtypeStruct((B * L, D), jnp.float32),
        grid_spec=pltpu.PrefetchScalarGridSpec(
            num_scalar_prefetch=0,
            grid=grid,
            in_specs=[
                pl.BlockSpec((nb * L, D), lambda g: (g, 0)),      # x (flattened)
                pl.BlockSpec((D, 2 * E), lambda g: (0, 0)),       # fused in_proj weight
                pl.BlockSpec((PR, E), lambda g: (0, 0)),          # packed params
            ],
            out_specs=pl.BlockSpec((nb * L, D), lambda g: (g, 0)),
        ),
        compiler_params=pltpu.CompilerParams(dimension_semantics=("parallel",)),
    )(x_flat, w_in, p_packed)
    return out_flat.reshape(B, L, D)


# ---------------------- deterministic parameter init -------------------------
def make_params(key):
    D, E, N, K, R = D_MODEL, D_INNER, D_STATE, D_CONV, DT_RANK
    ks = jax.random.split(key, 7)

    def uni(k, shape, bound):
        return jax.random.uniform(k, shape, jnp.float32, -bound, bound)

    in_proj_w = uni(ks[0], (2 * E, D), 1.0 / math.sqrt(D))
    conv_w = uni(ks[1], (E, 1, K), 1.0 / math.sqrt(K))
    conv_b = uni(ks[2], (E,), 1.0 / math.sqrt(K))
    x_proj_w = uni(ks[3], (R + 2 * N, E), 1.0 / math.sqrt(E))
    dt_init_std = R ** (-0.5) * 1.0          # dt_scale = 1.0, dt_init = 'random'
    dt_proj_w = uni(ks[4], (E, R), dt_init_std)
    u = jax.random.uniform(ks[5], (E,), jnp.float32)
    dt = jnp.exp(u * (math.log(DT_MAX) - math.log(DT_MIN)) + math.log(DT_MIN))
    dt = jnp.maximum(dt, DT_INIT_FLOOR)
    dt_proj_b = dt + jnp.log(-jnp.expm1(-dt))            # inv_dt
    A_log = jnp.log(jnp.tile(jnp.arange(1, N + 1, dtype=jnp.float32)[None, :],
                             (E, 1)))
    D_param = jnp.ones((E,), jnp.float32)
    out_proj_w = uni(ks[6], (D, E), 1.0 / math.sqrt(E))
    norm_w = jnp.ones((D,), jnp.float32)
    return dict(in_proj_w=in_proj_w, conv_w=conv_w, conv_b=conv_b,
                x_proj_w=x_proj_w, dt_proj_w=dt_proj_w, dt_proj_b=dt_proj_b,
                A_log=A_log, D=D_param, out_proj_w=out_proj_w, norm_w=norm_w)


# -------------------------- pure-JAX reference --------------------------------
def residual_block_ref(x, params):
    E, N, K, R = D_INNER, D_STATE, D_CONV, DT_RANK
    Bsz, L, _ = x.shape
    xn = x * lax.rsqrt(jnp.mean(x * x, axis=-1, keepdims=True) + EPS) * params["norm_w"]
    xz = xn @ params["in_proj_w"].T
    xs, z = xz[..., :E], xz[..., E:]
    w = params["conv_w"][:, 0, :]                      # (E, K)
    xs_pad = jnp.pad(xs, ((0, 0), (K - 1, 0), (0, 0)))
    conv = jnp.zeros_like(xs)
    for k in range(K):
        conv = conv + xs_pad[:, k:k + L, :] * w[:, k][None, None, :]
    xc = jax.nn.silu(conv + params["conv_b"])
    dbc = xc @ params["x_proj_w"].T
    delta_r, Bm, Cm = dbc[..., :R], dbc[..., R:R + N], dbc[..., R + N:]
    delta = jax.nn.softplus(delta_r @ params["dt_proj_w"].T + params["dt_proj_b"])
    A = -jnp.exp(params["A_log"])
    dA = jnp.exp(delta[..., None] * A)
    bx = (delta * xc)[..., None] * Bm[:, :, None, :]

    def step(h, inp):
        dA_t, bx_t = inp
        h = dA_t * h + bx_t
        return h, h

    h0 = jnp.zeros((Bsz, E, N), jnp.float32)
    _, hs = lax.scan(step, h0, (jnp.swapaxes(dA, 0, 1), jnp.swapaxes(bx, 0, 1)))
    hs = jnp.swapaxes(hs, 0, 1)                         # (B, L, E, N)
    y = jnp.sum(hs * Cm[:, :, None, :], axis=-1) + params["D"] * xc
    out = (y * jax.nn.silu(z)) @ params["out_proj_w"].T
    return out + x


# --------------------------------- main ---------------------------------------
if __name__ == "__main__":
    key = jax.random.PRNGKey(0)
    k_x, k_p = jax.random.split(key)
    x = jax.random.normal(k_x, (BATCH, SEQ, D_MODEL), jnp.float32)
    params = make_params(k_p)

    out = jax.jit(residual_block_pallas)(x, params)
    out = jax.block_until_ready(out)

    ref = residual_block_ref(x, params)
    assert out.shape == (BATCH, SEQ, D_MODEL)
    assert jnp.allclose(out, ref, atol=2e-2, rtol=2e-2), \
        float(jnp.max(jnp.abs(out - ref)))

    print("KERNEL_OK")
</pallas_src>

<mosaic_0001>
module attributes {stable_mosaic.version = 11 : i64} {
  func.func @_residual_mamba_kernel(%arg0: i32, %arg1: memref<8x32xf32, #tpu.memory_space<vmem>>, %arg2: memref<32x128xf32, #tpu.memory_space<vmem>>, %arg3: memref<184x64xf32, #tpu.memory_space<vmem>>, %arg4: memref<8x32xf32, #tpu.memory_space<vmem>>) attributes {dimension_semantics = [#tpu.dimension_semantics<parallel>], iteration_bounds = array<i64: 2>, scalar_prefetch = 0 : i64, scratch_operands = 0 : i64, tpu.core_type = #tpu.core_type<tc>, window_params = [{transform_indices = @transform_0, window_bounds = array<i64: 8, 32>}, {pipeline_mode = #tpu.pipeline_mode<synchronous>, transform_indices = @transform_1, window_bounds = array<i64: 32, 128>}, {pipeline_mode = #tpu.pipeline_mode<synchronous>, transform_indices = @transform_2, window_bounds = array<i64: 184, 64>}, {transform_indices = @transform_3, window_bounds = array<i64: 8, 32>}]} {
    %c0 = arith.constant 0 : index
    %c0_0 = arith.constant 0 : index
    %0 = vector.load %arg2[%c0, %c0_0] : memref<32x128xf32, #tpu.memory_space<vmem>>, vector<32x128xf32>
    %c0_1 = arith.constant 0 : index
    %c0_2 = arith.constant 0 : index
    %1 = vector.load %arg3[%c0_1, %c0_2] : memref<184x64xf32, #tpu.memory_space<vmem>>, vector<184x64xf32>
    %2 = vector.extract_strided_slice %1 {offsets = [0, 0], sizes = [64, 64], strides = [1, 1]} : vector<184x64xf32> to vector<64x64xf32>
    %3 = vector.extract_strided_slice %1 {offsets = [64, 0], sizes = [64, 32], strides = [1, 1]} : vector<184x64xf32> to vector<64x32xf32>
    %4 = vector.extract_strided_slice %1 {offsets = [128, 0], sizes = [32, 64], strides = [1, 1]} : vector<184x64xf32> to vector<32x64xf32>
    %5 = vector.extract_strided_slice %1 {offsets = [160, 0], sizes = [16, 64], strides = [1, 1]} : vector<184x64xf32> to vector<16x64xf32>
    %6 = vector.extract_strided_slice %1 {offsets = [176, 0], sizes = [8, 64], strides = [1, 1]} : vector<184x64xf32> to vector<8x64xf32>
    %7 = vector.extract_strided_slice %6 {offsets = [0, 0], sizes = [4, 64], strides = [1, 1]} : vector<8x64xf32> to vector<4x64xf32>
    %8 = vector.extract_strided_slice %6 {offsets = [4, 0], sizes = [1, 64], strides = [1, 1]} : vector<8x64xf32> to vector<1x64xf32>
    %9 = vector.extract_strided_slice %6 {offsets = [5, 0], sizes = [1, 64], strides = [1, 1]} : vector<8x64xf32> to vector<1x64xf32>
    %10 = vector.extract_strided_slice %6 {offsets = [6, 0], sizes = [1, 64], strides = [1, 1]} : vector<8x64xf32> to vector<1x64xf32>
    %11 = vector.extract_strided_slice %6 {offsets = [7, 0], sizes = [1, 32], strides = [1, 1]} : vector<8x64xf32> to vector<1x32xf32>
    %c0_3 = arith.constant 0 : index
    %c0_4 = arith.constant 0 : index
    %12 = vector.load %arg1[%c0_3, %c0_4] : memref<8x32xf32, #tpu.memory_space<vmem>>, vector<8x32xf32>
    %13 = arith.mulf %12, %12 : vector<8x32xf32>
    %cst = arith.constant dense<0.000000e+00> : vector<8xf32>
    %14 = vector.multi_reduction <add>, %13, %cst [1] : vector<8x32xf32> to vector<8xf32>
    %15 = vector.shape_cast %14 : vector<8xf32> to vector<8x1xf32>
    %cst_5 = arith.constant 3.200000e+01 : f32
    %16 = vector.broadcast %cst_5 : f32 to vector<8x1xf32>
    %17 = arith.divf %15, %16 : vector<8x1xf32>
    %cst_6 = arith.constant 9.99999974E-6 : f32
    %18 = vector.broadcast %cst_6 : f32 to vector<8x1xf32>
    %19 = arith.addf %17, %18 : vector<8x1xf32>
    %20 = math.rsqrt %19 : vector<8x1xf32>
    %21 = vector.broadcast %20 : vector<8x1xf32> to vector<8x32xf32>
    %22 = arith.mulf %12, %21 : vector<8x32xf32>
    %23 = vector.broadcast %11 : vector<1x32xf32> to vector<8x32xf32>
    %24 = arith.mulf %22, %23 : vector<8x32xf32>
    %cst_7 = arith.constant dense<0.000000e+00> : vector<8x128xf32>
    %25 = tpu.matmul %24, %0, %cst_7 {dimension_numbers = #tpu.dot_dimension_numbers<[1], [0], [0], [1], [0, 0, 1, 1], [], []>} : vector<8x32xf32>, vector<32x128xf32>, vector<8x128xf32> -> vector<8x128xf32>
    %26 = vector.extract_strided_slice %25 {offsets = [0, 0], sizes = [8, 64], strides = [1, 1]} : vector<8x128xf32> to vector<8x64xf32>
    %27 = vector.extract_strided_slice %25 {offsets = [0, 64], sizes = [8, 64], strides = [1, 1]} : vector<8x128xf32> to vector<8x64xf32>
    %cst_8 = arith.constant 0.000000e+00 : f32
    %28 = vector.broadcast %cst_8 : f32 to vector<3x64xf32>
    %29 = tpu.concatenate %28, %26 in 0 : vector<3x64xf32>, vector<8x64xf32> -> vector<11x64xf32>
    %30 = vector.extract_strided_slice %7 {offsets = [0, 0], sizes = [1, 64], strides = [1, 1]} : vector<4x64xf32> to vector<1x64xf32>
    %31 = vector.extract_strided_slice %29 {offsets = [0, 0], sizes = [8, 64], strides = [1, 1]} : vector<11x64xf32> to vector<8x64xf32>
    %32 = vector.broadcast %30 : vector<1x64xf32> to vector<8x64xf32>
    %33 = arith.mulf %32, %31 : vector<8x64xf32>
    %34 = vector.broadcast %8 : vector<1x64xf32> to vector<8x64xf32>
    %35 = arith.addf %34, %33 : vector<8x64xf32>
    %36 = vector.extract_strided_slice %7 {offsets = [1, 0], sizes = [1, 64], strides = [1, 1]} : vector<4x64xf32> to vector<1x64xf32>
    %37 = vector.extract_strided_slice %29 {offsets = [1, 0], sizes = [8, 64], strides = [1, 1]} : vector<11x64xf32> to vector<8x64xf32>
    %38 = vector.broadcast %36 : vector<1x64xf32> to vector<8x64xf32>
    %39 = arith.mulf %38, %37 : vector<8x64xf32>
    %40 = arith.addf %35, %39 : vector<8x64xf32>
    %41 = vector.extract_strided_slice %7 {offsets = [2, 0], sizes = [1, 64], strides = [1, 1]} : vector<4x64xf32> to vector<1x64xf32>
    %42 = vector.extract_strided_slice %29 {offsets = [2, 0], sizes = [8, 64], strides = [1, 1]} : vector<11x64xf32> to vector<8x64xf32>
    %43 = vector.broadcast %41 : vector<1x64xf32> to vector<8x64xf32>
    %44 = arith.mulf %43, %42 : vector<8x64xf32>
    %45 = arith.addf %40, %44 : vector<8x64xf32>
    %46 = vector.extract_strided_slice %7 {offsets = [3, 0], sizes = [1, 64], strides = [1, 1]} : vector<4x64xf32> to vector<1x64xf32>
    %47 = vector.extract_strided_slice %29 {offsets = [3, 0], sizes = [8, 64], strides = [1, 1]} : vector<11x64xf32> to vector<8x64xf32>
    %48 = vector.broadcast %46 : vector<1x64xf32> to vector<8x64xf32>
    %49 = arith.mulf %48, %47 : vector<8x64xf32>
    %50 = arith.addf %45, %49 : vector<8x64xf32>
    %51 = arith.negf %50 : vector<8x64xf32>
    %52 = math.exp %51 : vector<8x64xf32>
    %cst_9 = arith.constant 1.000000e+00 : f32
    %53 = vector.broadcast %cst_9 : f32 to vector<8x64xf32>
    %54 = arith.addf %53, %52 : vector<8x64xf32>
    %55 = arith.divf %53, %54 : vector<8x64xf32>
    %56 = arith.mulf %50, %55 : vector<8x64xf32>
    %cst_10 = arith.constant dense<0.000000e+00> : vector<8x64xf32>
    %57 = tpu.matmul %56, %2, %cst_10 {dimension_numbers = #tpu.dot_dimension_numbers<[1], [0], [0], [1], [0, 0, 1, 1], [], []>} : vector<8x64xf32>, vector<64x64xf32>, vector<8x64xf32> -> vector<8x64xf32>
    %58 = vector.broadcast %9 : vector<1x64xf32> to vector<8x64xf32>
    %59 = arith.addf %57, %58 : vector<8x64xf32>
    %cst_11 = arith.constant 0.000000e+00 : f32
    %60 = vector.broadcast %cst_11 : f32 to vector<8x64xf32>
    %61 = arith.maximumf %59, %60 : vector<8x64xf32>
    %62 = vector.broadcast %cst_11 : f32 to vector<8x64xf32>
    %63 = arith.subf %59, %62 : vector<8x64xf32>
    %64 = arith.cmpf one, %63, %63 : vector<8x64xf32>
    %65 = vector.broadcast %cst_11 : f32 to vector<8x64xf32>
    %66 = arith.addf %59, %65 : vector<8x64xf32>
    %67 = math.absf %63 : vector<8x64xf32>
    %cst_12 = arith.constant 0.000000e+00 : f32
    %68 = vector.broadcast %cst_12 : f32 to vector<8x64xf32>
    %69 = arith.subf %68, %67 : vector<8x64xf32>
    %70 = math.exp %69 : vector<8x64xf32>
    %71 = math.log1p %70 : vector<8x64xf32>
    %72 = arith.addf %61, %71 : vector<8x64xf32>
    %73 = arith.select %64, %66, %72 : vector<8x64xi1>, vector<8x64xf32>
    %cst_13 = arith.constant dense<0.000000e+00> : vector<32x8xf32>
    %74 = tpu.matmul %4, %56, %cst_13 {dimension_numbers = #tpu.dot_dimension_numbers<[1], [1], [0], [0], [0, 0, 1, 0], [], []>} : vector<32x64xf32>, vector<8x64xf32>, vector<32x8xf32> -> vector<32x8xf32>
    %75 = arith.mulf %73, %56 : vector<8x64xf32>
    %76 = vector.extract_strided_slice %74 {offsets = [0, 0], sizes = [16, 8], strides = [1, 1]} : vector<32x8xf32> to vector<16x8xf32>
    %77 = vector.extract_strided_slice %74 {offsets = [16, 0], sizes = [16, 8], strides = [1, 1]} : vector<32x8xf32> to vector<16x8xf32>
    %cst_14 = arith.constant 0.000000e+00 : f32
    %78 = vector.broadcast %cst_14 : f32 to vector<16x64xf32>
    %79 = vector.extract_strided_slice %73 {offsets = [0, 0], sizes = [1, 64], strides = [1, 1]} : vector<8x64xf32> to vector<1x64xf32>
    %80 = vector.broadcast %79 : vector<1x64xf32> to vector<16x64xf32>
    %81 = arith.mulf %80, %5 : vector<16x64xf32>
    %82 = math.exp %81 : vector<16x64xf32>
    %83 = arith.mulf %82, %78 : vector<16x64xf32>
    %84 = vector.extract_strided_slice %76 {offsets = [0, 0], sizes = [16, 1], strides = [1, 1]} : vector<16x8xf32> to vector<16x1xf32>
    %85 = vector.extract_strided_slice %75 {offsets = [0, 0], sizes = [1, 64], strides = [1, 1]} : vector<8x64xf32> to vector<1x64xf32>
    %86 = vector.broadcast %84 : vector<16x1xf32> to vector<16x64xf32>
    %87 = vector.broadcast %85 : vector<1x64xf32> to vector<16x64xf32>
    %88 = arith.mulf %86, %87 : vector<16x64xf32>
    %89 = arith.addf %83, %88 : vector<16x64xf32>
    %90 = vector.extract_strided_slice %77 {offsets = [0, 0], sizes = [16, 1], strides = [1, 1]} : vector<16x8xf32> to vector<16x1xf32>
    %91 = vector.broadcast %90 : vector<16x1xf32> to vector<16x64xf32>
    %92 = arith.mulf %91, %89 : vector<16x64xf32>
    %cst_15 = arith.constant dense<0.000000e+00> : vector<64xf32>
    %93 = vector.multi_reduction <add>, %92, %cst_15 [0] : vector<16x64xf32> to vector<64xf32>
    %94 = vector.shape_cast %93 : vector<64xf32> to vector<1x64xf32>
    %95 = vector.extract_strided_slice %73 {offsets = [1, 0], sizes = [1, 64], strides = [1, 1]} : vector<8x64xf32> to vector<1x64xf32>
    %96 = vector.broadcast %95 : vector<1x64xf32> to vector<16x64xf32>
    %97 = arith.mulf %96, %5 : vector<16x64xf32>
    %98 = math.exp %97 : vector<16x64xf32>
    %99 = arith.mulf %98, %89 : vector<16x64xf32>
    %100 = vector.extract_strided_slice %76 {offsets = [0, 1], sizes = [16, 1], strides = [1, 1]} : vector<16x8xf32> to vector<16x1xf32>
    %101 = vector.extract_strided_slice %75 {offsets = [1, 0], sizes = [1, 64], strides = [1, 1]} : vector<8x64xf32> to vector<1x64xf32>
    %102 = vector.broadcast %100 : vector<16x1xf32> to vector<16x64xf32>
    %103 = vector.broadcast %101 : vector<1x64xf32> to vector<16x64xf32>
    %104 = arith.mulf %102, %103 : vector<16x64xf32>
    %105 = arith.addf %99, %104 : vector<16x64xf32>
    %106 = vector.extract_strided_slice %77 {offsets = [0, 1], sizes = [16, 1], strides = [1, 1]} : vector<16x8xf32> to vector<16x1xf32>
    %107 = vector.broadcast %106 : vector<16x1xf32> to vector<16x64xf32>
    %108 = arith.mulf %107, %105 : vector<16x64xf32>
    %cst_16 = arith.constant dense<0.000000e+00> : vector<64xf32>
    %109 = vector.multi_reduction <add>, %108, %cst_16 [0] : vector<16x64xf32> to vector<64xf32>
    %110 = vector.shape_cast %109 : vector<64xf32> to vector<1x64xf32>
    %111 = vector.extract_strided_slice %73 {offsets = [2, 0], sizes = [1, 64], strides = [1, 1]} : vector<8x64xf32> to vector<1x64xf32>
    %112 = vector.broadcast %111 : vector<1x64xf32> to vector<16x64xf32>
    %113 = arith.mulf %112, %5 : vector<16x64xf32>
    %114 = math.exp %113 : vector<16x64xf32>
    %115 = arith.mulf %114, %105 : vector<16x64xf32>
    %116 = vector.extract_strided_slice %76 {offsets = [0, 2], sizes = [16, 1], strides = [1, 1]} : vector<16x8xf32> to vector<16x1xf32>
    %117 = vector.extract_strided_slice %75 {offsets = [2, 0], sizes = [1, 64], strides = [1, 1]} : vector<8x64xf32> to vector<1x64xf32>
    %118 = vector.broadcast %116 : vector<16x1xf32> to vector<16x64xf32>
    %119 = vector.broadcast %117 : vector<1x64xf32> to vector<16x64xf32>
    %120 = arith.mulf %118, %119 : vector<16x64xf32>
    %121 = arith.addf %115, %120 : vector<16x64xf32>
    %122 = vector.extract_strided_slice %77 {offsets = [0, 2], sizes = [16, 1], strides = [1, 1]} : vector<16x8xf32> to vector<16x1xf32>
    %123 = vector.broadcast %122 : vector<16x1xf32> to vector<16x64xf32>
    %124 = arith.mulf %123, %121 : vector<16x64xf32>
    %cst_17 = arith.constant dense<0.000000e+00> : vector<64xf32>
    %125 = vector.multi_reduction <add>, %124, %cst_17 [0] : vector<16x64xf32> to vector<64xf32>
    %126 = vector.shape_cast %125 : vector<64xf32> to vector<1x64xf32>
    %127 = vector.extract_strided_slice %73 {offsets = [3, 0], sizes = [1, 64], strides = [1, 1]} : vector<8x64xf32> to vector<1x64xf32>
    %128 = vector.broadcast %127 : vector<1x64xf32> to vector<16x64xf32>
    %129 = arith.mulf %128, %5 : vector<16x64xf32>
    %130 = math.exp %129 : vector<16x64xf32>
    %131 = arith.mulf %130, %121 : vector<16x64xf32>
    %132 = vector.extract_strided_slice %76 {offsets = [0, 3], sizes = [16, 1], strides = [1, 1]} : vector<16x8xf32> to vector<16x1xf32>
    %133 = vector.extract_strided_slice %75 {offsets = [3, 0], sizes = [1, 64], strides = [1, 1]} : vector<8x64xf32> to vector<1x64xf32>
    %134 = vector.broadcast %132 : vector<16x1xf32> to vector<16x64xf32>
    %135 = vector.broadcast %133 : vector<1x64xf32> to vector<16x64xf32>
    %136 = arith.mulf %134, %135 : vector<16x64xf32>
    %137 = arith.addf %131, %136 : vector<16x64xf32>
    %138 = vector.extract_strided_slice %77 {offsets = [0, 3], sizes = [16, 1], strides = [1, 1]} : vector<16x8xf32> to vector<16x1xf32>
    %139 = vector.broadcast %138 : vector<16x1xf32> to vector<16x64xf32>
    %140 = arith.mulf %139, %137 : vector<16x64xf32>
    %cst_18 = arith.constant dense<0.000000e+00> : vector<64xf32>
    %141 = vector.multi_reduction <add>, %140, %cst_18 [0] : vector<16x64xf32> to vector<64xf32>
    %142 = vector.shape_cast %141 : vector<64xf32> to vector<1x64xf32>
    %143 = vector.extract_strided_slice %73 {offsets = [4, 0], sizes = [1, 64], strides = [1, 1]} : vector<8x64xf32> to vector<1x64xf32>
    %144 = vector.broadcast %143 : vector<1x64xf32> to vector<16x64xf32>
    %145 = arith.mulf %144, %5 : vector<16x64xf32>
    %146 = math.exp %145 : vector<16x64xf32>
    %147 = arith.mulf %146, %137 : vector<16x64xf32>
    %148 = vector.extract_strided_slice %76 {offsets = [0, 4], sizes = [16, 1], strides = [1, 1]} : vector<16x8xf32> to vector<16x1xf32>
    %149 = vector.extract_strided_slice %75 {offsets = [4, 0], sizes = [1, 64], strides = [1, 1]} : vector<8x64xf32> to vector<1x64xf32>
    %150 = vector.broadcast %148 : vector<16x1xf32> to vector<16x64xf32>
    %151 = vector.broadcast %149 : vector<1x64xf32> to vector<16x64xf32>
    %152 = arith.mulf %150, %151 : vector<16x64xf32>
    %153 = arith.addf %147, %152 : vector<16x64xf32>
    %154 = vector.extract_strided_slice %77 {offsets = [0, 4], sizes = [16, 1], strides = [1, 1]} : vector<16x8xf32> to vector<16x1xf32>
    %155 = vector.broadcast %154 : vector<16x1xf32> to vector<16x64xf32>
    %156 = arith.mulf %155, %153 : vector<16x64xf32>
    %cst_19 = arith.constant dense<0.000000e+00> : vector<64xf32>
    %157 = vector.multi_reduction <add>, %156, %cst_19 [0] : vector<16x64xf32> to vector<64xf32>
    %158 = vector.shape_cast %157 : vector<64xf32> to vector<1x64xf32>
    %159 = vector.extract_strided_slice %73 {offsets = [5, 0], sizes = [1, 64], strides = [1, 1]} : vector<8x64xf32> to vector<1x64xf32>
    %160 = vector.broadcast %159 : vector<1x64xf32> to vector<16x64xf32>
    %161 = arith.mulf %160, %5 : vector<16x64xf32>
    %162 = math.exp %161 : vector<16x64xf32>
    %163 = arith.mulf %162, %153 : vector<16x64xf32>
    %164 = vector.extract_strided_slice %76 {offsets = [0, 5], sizes = [16, 1], strides = [1, 1]} : vector<16x8xf32> to vector<16x1xf32>
    %165 = vector.extract_strided_slice %75 {offsets = [5, 0], sizes = [1, 64], strides = [1, 1]} : vector<8x64xf32> to vector<1x64xf32>
    %166 = vector.broadcast %164 : vector<16x1xf32> to vector<16x64xf32>
    %167 = vector.broadcast %165 : vector<1x64xf32> to vector<16x64xf32>
    %168 = arith.mulf %166, %167 : vector<16x64xf32>
    %169 = arith.addf %163, %168 : vector<16x64xf32>
    %170 = vector.extract_strided_slice %77 {offsets = [0, 5], sizes = [16, 1], strides = [1, 1]} : vector<16x8xf32> to vector<16x1xf32>
    %171 = vector.broadcast %170 : vector<16x1xf32> to vector<16x64xf32>
    %172 = arith.mulf %171, %169 : vector<16x64xf32>
    %cst_20 = arith.constant dense<0.000000e+00> : vector<64xf32>
    %173 = vector.multi_reduction <add>, %172, %cst_20 [0] : vector<16x64xf32> to vector<64xf32>
    %174 = vector.shape_cast %173 : vector<64xf32> to vector<1x64xf32>
    %175 = vector.extract_strided_slice %73 {offsets = [6, 0], sizes = [1, 64], strides = [1, 1]} : vector<8x64xf32> to vector<1x64xf32>
    %176 = vector.broadcast %175 : vector<1x64xf32> to vector<16x64xf32>
    %177 = arith.mulf %176, %5 : vector<16x64xf32>
    %178 = math.exp %177 : vector<16x64xf32>
    %179 = arith.mulf %178, %169 : vector<16x64xf32>
    %180 = vector.extract_strided_slice %76 {offsets = [0, 6], sizes = [16, 1], strides = [1, 1]} : vector<16x8xf32> to vector<16x1xf32>
    %181 = vector.extract_strided_slice %75 {offsets = [6, 0], sizes = [1, 64], strides = [1, 1]} : vector<8x64xf32> to vector<1x64xf32>
    %182 = vector.broadcast %180 : vector<16x1xf32> to vector<16x64xf32>
    %183 = vector.broadcast %181 : vector<1x64xf32> to vector<16x64xf32>
    %184 = arith.mulf %182, %183 : vector<16x64xf32>
    %185 = arith.addf %179, %184 : vector<16x64xf32>
    %186 = vector.extract_strided_slice %77 {offsets = [0, 6], sizes = [16, 1], strides = [1, 1]} : vector<16x8xf32> to vector<16x1xf32>
    %187 = vector.broadcast %186 : vector<16x1xf32> to vector<16x64xf32>
    %188 = arith.mulf %187, %185 : vector<16x64xf32>
    %cst_21 = arith.constant dense<0.000000e+00> : vector<64xf32>
    %189 = vector.multi_reduction <add>, %188, %cst_21 [0] : vector<16x64xf32> to vector<64xf32>
    %190 = vector.shape_cast %189 : vector<64xf32> to vector<1x64xf32>
    %191 = vector.extract_strided_slice %73 {offsets = [7, 0], sizes = [1, 64], strides = [1, 1]} : vector<8x64xf32> to vector<1x64xf32>
    %192 = vector.broadcast %191 : vector<1x64xf32> to vector<16x64xf32>
    %193 = arith.mulf %192, %5 : vector<16x64xf32>
    %194 = math.exp %193 : vector<16x64xf32>
    %195 = arith.mulf %194, %185 : vector<16x64xf32>
    %196 = vector.extract_strided_slice %76 {offsets = [0, 7], sizes = [16, 1], strides = [1, 1]} : vector<16x8xf32> to vector<16x1xf32>
    %197 = vector.extract_strided_slice %75 {offsets = [7, 0], sizes = [1, 64], strides = [1, 1]} : vector<8x64xf32> to vector<1x64xf32>
    %198 = vector.broadcast %196 : vector<16x1xf32> to vector<16x64xf32>
    %199 = vector.broadcast %197 : vector<1x64xf32> to vector<16x64xf32>
    %200 = arith.mulf %198, %199 : vector<16x64xf32>
    %201 = arith.addf %195, %200 : vector<16x64xf32>
    %202 = vector.extract_strided_slice %77 {offsets = [0, 7], sizes = [16, 1], strides = [1, 1]} : vector<16x8xf32> to vector<16x1xf32>
    %203 = vector.broadcast %202 : vector<16x1xf32> to vector<16x64xf32>
    %204 = arith.mulf %203, %201 : vector<16x64xf32>
    %cst_22 = arith.constant dense<0.000000e+00> : vector<64xf32>
    %205 = vector.multi_reduction <add>, %204, %cst_22 [0] : vector<16x64xf32> to vector<64xf32>
    %206 = vector.shape_cast %205 : vector<64xf32> to vector<1x64xf32>
    %207 = tpu.concatenate %94, %110, %126, %142, %158, %174, %190, %206 in 0 : vector<1x64xf32>, vector<1x64xf32>, vector<1x64xf32>, vector<1x64xf32>, vector<1x64xf32>, vector<1x64xf32>, vector<1x64xf32>, vector<1x64xf32> -> vector<8x64xf32>
    %208 = vector.broadcast %10 : vector<1x64xf32> to vector<8x64xf32>
    %209 = arith.mulf %208, %56 : vector<8x64xf32>
    %210 = arith.addf %207, %209 : vector<8x64xf32>
    %211 = arith.negf %27 : vector<8x64xf32>
    %212 = math.exp %211 : vector<8x64xf32>
    %cst_23 = arith.constant 1.000000e+00 : f32
    %213 = vector.broadcast %cst_23 : f32 to vector<8x64xf32>
    %214 = arith.addf %213, %212 : vector<8x64xf32>
    %215 = arith.divf %213, %214 : vector<8x64xf32>
    %216 = arith.mulf %27, %215 : vector<8x64xf32>
    %217 = arith.mulf %210, %216 : vector<8x64xf32>
    %cst_24 = arith.constant dense<0.000000e+00> : vector<8x32xf32>
    %218 = tpu.matmul %217, %3, %cst_24 {dimension_numbers = #tpu.dot_dimension_numbers<[1], [0], [0], [1], [0, 0, 1, 1], [], []>} : vector<8x64xf32>, vector<64x32xf32>, vector<8x32xf32> -> vector<8x32xf32>
    %219 = arith.addf %218, %12 : vector<8x32xf32>
    %c0_25 = arith.constant 0 : index
    %c0_26 = arith.constant 0 : index
    %220 = vector.load %arg4[%c0_25, %c0_26] : memref<8x32xf32, #tpu.memory_space<vmem>>, vector<8x32xf32>
    tpu.vector_store %arg4[%c0_25, %c0_26], %219 {strides = array<i32>} : memref<8x32xf32, #tpu.memory_space<vmem>>, vector<8x32xf32>,
    return
  }
  func.func @transform_0(%arg0: i32) -> (i32, i32) {
    %c0_i32 = arith.constant 0 : i32
    %c0_i32_0 = arith.constant 0 : i32
    return %arg0, %c0_i32 : i32, i32
  }
  func.func @transform_1(%arg0: i32) -> (i32, i32) {
    %c0_i32 = arith.constant 0 : i32
    %c0_i32_0 = arith.constant 0 : i32
    %c0_i32_1 = arith.constant 0 : i32
    return %c0_i32, %c0_i32_0 : i32, i32
  }
  func.func @transform_2(%arg0: i32) -> (i32, i32) {
    %c0_i32 = arith.constant 0 : i32
    %c0_i32_0 = arith.constant 0 : i32
    %c0_i32_1 = arith.constant 0 : i32
    return %c0_i32, %c0_i32_0 : i32, i32
  }
  func.func @transform_3(%arg0: i32) -> (i32, i32) {
    %c0_i32 = arith.constant 0 : i32
    %c0_i32_0 = arith.constant 0 : i32
    return %arg0, %c0_i32 : i32, i32
  }
}

</mosaic_0001>

<bundles_post_ra>
// kernel: residual_block_pallas.1
= control target key start
LH: loop header
LB: loop body
LE: loop exit
PB: predicated region body
PF: predicated region fallthrough
CT: control target
= control target key end

     0   :  { %8 = vsyncpa [#allocation3], 0  ;;  %s1956_s0 = inlined_call_operand.vmem [shape: f32[16,32], index: 0, kind: input, shape index: {}]   ;;  %s1957_s1 = inlined_call_operand.vmem [shape: f32[32,128], index: 1, kind: input, shape index: {}]   ;;  %s1958_s2 = inlined_call_operand.vmem [shape: f32[184,64], index: 2, kind: input, shape index: {}]   ;;  %s1959_s3 = inlined_call_operand.hbm [shape: f32[16,32], index: 3, kind: output, shape index: {}]  }
   0x1   :  { %10 = vsyncpa [#allocation3 + $0x1], 0  ;;  %s1457_s12 = smov 0   ;;  %s1459_s13 = smov 0  }
   0x2   :  { %s1461_s14 = smov 0   ;;  %s1463_s15 = smov 0  }
   0x3 LB: > { %s1478_s16 = sadd.s32 4294967295, %s1422_s15   ;;  %s1095_s17 = sadd.s32 4294967294, %s1422_s15   ;;  %s1422_s15 = sphi %s1463_s15, %s1965_s15   ;;  %s1418_s14 = sphi %s1461_s14, %s1964_s14   ;;  %s1414_s13 = sphi %s1459_s13, %s1963_s13   ;;  %s1410_s12 = sphi %s1457_s12, %s1962_s12  }
   0x4   : > { %s1482_s18 = sadd.s32 1, %s1422_s15   ;;  %s91_s19 = sadd.s32 1, %s1418_s14 }
   0x5   : > { %s88_s20 = ssub.s32 %s1422_s15, %s1482_s18  ;;  %p101_p0 = scmp.ne.s32.totalorder %s1418_s14, %s1414_s13 }
   0x6   : > { %p89_p1 = scmp.eq.s32.totalorder %s88_s20, 0  ;;  %p102_p2 = scmp.eq.s32.totalorder %s1478_s16, 1 }
   0x7   : > { %p107_p3 = scmp.ne.s32.totalorder %s1414_s13, %s1410_s12  ;;  %p108_p4 = scmp.eq.s32.totalorder %s1095_s17, 1 }
   0x8   : > { %s1493_s21 = scalar_select %p89_p1, %s1418_s14, %s91_s19  }
   0x9   : > { %p1495_p5 = por %p102_p2, %p101_p0  ;;  %p1499_p6 = por %p108_p4, %p107_p3 }
   0xa   : > { %p1098_p7 = scmp.ge.s32.totalorder %s1422_s15, 1  ;;  %p139_p8 = scmp.lt.s32.totalorder %s1422_s15, 3 }
   0xc   : > { %p140_p9 = pnand %p1098_p7, %p139_p8 }
   0xd   : > { %p162_p10 = scmp.lt.s32.totalorder (!%p140_p9), %s1478_s16, 1  ;;  %vm195_vm0 = vcmask (!%p140_p9), 261120   ;;  %v166_v3 = vld [vmem:[%s1957_s1] sm:$0xff] (!%p140_p9)  ;;  %v167_v4 = vld [vmem:[%s1957_s1 + $0x8] sm:$0xff] (!%p140_p9)  ;;  %v168_v5 = vld [vmem:[%s1957_s1 + $0x10] sm:$0xff] (!%p140_p9)  ;;  %v1424_v6 = vmov (!%p140_p9), 0.0|0.0   ;;  %v204_v13 = vlaneseq (!%p140_p9) }
   0xe   : > { %143 = sbr.rel (%p140_p9) target bundleno = 1153 (0x481), region = 32  ;;  %1200 = vmatprep.subr.bf16.mxu1 (!%p140_p9), %v1424_v6  ;;  %v1201_v7 = vpack.c.bf16 (!%p140_p9), %v167_v4, %v166_v3  ;;  %v169_v8 = vld [vmem:[%s1957_s1 + $0x18] sm:$0xff] (!%p140_p9)  ;;  %vm1425_vm1 = vmmov (!%p140_p9), 0   ;;  %v1426_v9 = vmov (!%p140_p9), 0.0   ;;  %v1539_v17 = vld [vmem:[%s1958_s2 + $0xb0] sm:$0xff] (!%p140_p9)  ;;  %v170_v22 = vld [vmem:[%s1958_s2] sm:$0xff] (!%p140_p9) }
   0xf   : > { %1151 = vmatprep.mubr.msk.f32.mxu1 (!%p140_p9), %vm1425_vm1, %v1426_v9  ;;  %v1204_v10 = vpack.c.bf16 (!%p140_p9), %v169_v8, %v168_v5  ;;  %v1531_v15 = vshrl.u32 (!%p140_p9), %v204_v13, 7  ;;  %v171_v23 = vld [vmem:[%s1958_s2 + $0x8] sm:$0xff] (!%p140_p9)  ;;  %v172_v25 = vld [vmem:[%s1958_s2 + $0x10] sm:$0xff] (!%p140_p9)  ;;  %v173_v26 = vld [vmem:[%s1958_s2 + $0x18] sm:$0xff] (!%p140_p9)  ;;  %vm350_vm2 = vcmask (!%p140_p9), 523264   ;;  %vm285_vm3 = vcmask (!%p140_p9), 1042432  }
  0x10   : > { %1202 = vmatpush3.bf16.msra.mxu1 (!%p140_p9), %v1201_v7  ;;  %v1207_v24 = vpack.c.bf16 (!%p140_p9), %v171_v23, %v170_v22  ;;  %v1210_v27 = vpack.c.bf16 (!%p140_p9), %v173_v26, %v172_v25  ;;  %v174_v28 = vld [vmem:[%s1958_s2 + $0x20] sm:$0xff] (!%p140_p9)  ;;  %v175_v29 = vld [vmem:[%s1958_s2 + $0x28] sm:$0xff] (!%p140_p9)  ;;  %v176_v31 = vld [vmem:[%s1958_s2 + $0x30] sm:$0xff] (!%p140_p9)  ;;  %vm305_vm4 = vcmask (!%p140_p9), 1046528   ;;  %vm319_vm5 = vcmask (!%p140_p9), 1045504   ;;  %s1435_s4 = smov (!%p140_p9), 64  }
  0x11   : > { %1203 = vmatprep.subr.bf16.mxu1 (!%p140_p9), %v1424_v6  ;;  %v1534_v16 = vsub.s32 (!%p140_p9), 7, %v1531_v15  ;;  %v1213_v30 = vpack.c.bf16 (!%p140_p9), %v175_v29, %v174_v28  ;;  %v177_v32 = vld [vmem:[%s1958_s2 + $0x38] sm:$0xff] (!%p140_p9)  ;;  %v186_v34 = vld [vmem:[%s1958_s2 + $0x80] sm:$0xff] (!%p140_p9)  ;;  %v1578_v35 = vsub.s32 (!%p140_p9), 1, %v1531_v15  ;;  %v1581_v36 = vsub.s32 (!%p140_p9), 2, %v1531_v15  ;;  %v188_v13 = vld [vmem:[%s1958_s2 + $0x90] sm:$0xff] (!%p140_p9) }
  0x12   : > { %v1216_v33 = vpack.c.bf16 (!%p140_p9), %v177_v32, %v176_v31  ;;  %1175 = vmatprep.mubr.msk.f32.mxu0 (!%p140_p9), %vm350_vm2, %v186_v34  ;;  %v1584_v37 = vsub.s32 (!%p140_p9), 3, %v1531_v15  ;;  %v1587_v38 = vsub.s32 (!%p140_p9), 0, %v1531_v15  ;;  %v1590_v39 = vsub.s32 (!%p140_p9), 4, %v1531_v15  ;;  %s159_s6 = sand.u32 (!%p140_p9), 1, %s1414_s13   ;;  %s1112_s8 = sshll.u32 (!%p140_p9), %s1478_s16, 7 }
  0x13   : > { %v207_v18 = vrot.slane (!%p140_p9), %v1539_v17, %v1534_v16  ;;  %v300_v40 = vrot.slane (!%p140_p9), %v1539_v17, %v1578_v35  ;;  %v314_v41 = vrot.slane (!%p140_p9), %v1539_v17, %v1581_v36  ;;  %vm333_vm6 = vcmask (!%p140_p9), 1044480   ;;  %s1099_s7 = sshll.u32 (!%p140_p9), %s159_s6, 3  ;;  %s1913_s19 = scalar_lea.hbm (!%p140_p9), %s1959_s3, %s1112_s8 }
  0x14   : > { %1205 = vmatpush3.bf16.msra.mxu1 (!%p140_p9), %v1204_v10  ;;  %v328_v42 = vrot.slane (!%p140_p9), %v1539_v17, %v1584_v37  ;;  %v290_v44 = vrot.slane (!%p140_p9), %v1539_v17, %v1587_v38  ;;  %v295_v47 = vrot.slane (!%p140_p9), %v1539_v17, %v1590_v39  ;;  %v1429_v25 = vmov (!%p140_p9), 1   ;;  %s161_s9 = scalar_lea.vmem (!%p140_p9), [#allocation2], %s1099_s7  ;;  %s1023_s20 = scalar_lea.sflag (!%p140_p9), [#allocation3], %s159_s6 }
  0x15   : > { %s163_s24 = scalar_select %p162_p10, %s1478_s16, 1  ;;  %1206 = vmatprep.subr.bf16.mxu1 %v1424_v6  ;;  %v1432_v28 = vmov 3   ;;  %v1433_v29 = vmov 4   ;;  %v1654_v31 = vsub.s32 5, %v1531_v15  ;;  %vm920_vm9 = vcmask 1040384  }
  0x16   : > { %vm922_vm10 = vcmask 1041408   ;;  %vm925_vm11 = vcmask 1043456   ;;  %s1036_s10 = sshll.u32 %s161_s9, 4  ;;  %s1915_s10 = int_to_ptr.vmem [resolvable:$true] %s1036_s10 }
  0x17   : > { %s1100_s25 = sshll.u32 %s163_s24, 3  ;;  %v349_v32 = vrot.slane %v1539_v17, %v1654_v31  ;;  %s1360_s16 = scalar_lea.vmem %s1915_s10, 128 }
  0x18   : > { %s1510_s28 = scalar_lea.vmem %s1956_s0, %s1100_s25  ;;  %p1361_p11 = scmp.ne.s32.totalorder %s1915_s10, %s1360_s16 }
  0x19   : > { %v193_v0 = vld [vmem:[%s1510_s28] sm:$0xff] }
  0x1a   : > { %v194_v1 = vmul.f32 %v193_v0, %v193_v0  ;;  %p1362_p12 = pnand %p1361_p11, %p1495_p5 }
  0x1c   : > { %v196_v2 = vsel %vm195_vm0, %v194_v1, 0.0  ;;  %p1363_p13 = pneg %p1362_p12 }
  0x1d   : > { %197 = vadd.xlane.f32.xlu0 %v196_v2 }
  0xaa   : > { %v198_v11 = vpop.xlane.xlu0 %197 }
  0xab   : > { %v200_v12 = vmul.f32 0.03125, %v198_v11 }
  0xad   : > { %v201_v14 = vadd.f32 1e-05, %v200_v12  ;;  %v187_v12 = vld [vmem:[%s1958_s2 + $0x88] sm:$0xff] }
  0xaf   : > { %1313 = vrsqrt.f32 %v201_v14  ;;  %v189_v14 = vld [vmem:[%s1958_s2 + $0x98] sm:$0xff] }
  0xb9   : > { %v1314_v19 = vpop.eup %1313 }
  0xba   : > { %v203_v20 = vmul.f32 %v1314_v19, %v193_v0  ;;  %v1428_v19 = vmov 0  }
  0xbb   : > { %1281 = vset.pattern.permute.xlu1 %v1428_v19 }
  0xbc   : > { %v208_v21 = vmul.f32 %v207_v18, %v203_v20  ;;  %v1427_v18 = vmov 6  }
  0xbd   : > { %1287 = vset.pattern.permute.xlu0 %v1427_v18 }
  0xbe   : > { %1152 = vmatmul.mubr.msk.f32.vlgmr.msra.gmra.mrb[0].mxu1 %vm195_vm0, %v208_v21 }
  0xbf   : > { %1170 = vmatprep.mubr.msk.f32.mxu1 %vm1425_vm1, %v1426_v9  ;;  %1208 = vmatpush3.bf16.msra.mxu1 %v1207_v24 }
  0xc0   : > { %1209 = vmatprep.subr.bf16.mxu1 %v1424_v6 }
  0xc3   : > { %1211 = vmatpush3.bf16.msra.mxu1 %v1210_v27  ;;  %v1431_v27 = vmov 7  }
  0xc4   : > { %1212 = vmatprep.subr.bf16.mxu1 %v1424_v6 }
  0xc7   : > { %1214 = vmatpush3.bf16.msra.mxu1 %v1213_v30  ;;  %v1434_v30 = vmov 5  }
  0xc8   : > { %1215 = vmatprep.subr.bf16.mxu1 %v1424_v6 }
  0xcb   : > { %1217 = vmatpush3.bf16.msra.mxu1 %v1216_v33 }
 0x191   : > { %v1598_v43 = vpop.f32.mrb[0].mxu1 }
 0x192   : > { %v283_v45 = vrot.slane %v1598_v43, 5  ;;  %v1153_v46 = vpop.f32.mrb[1].mxu1 }
 0x194   : > { %v286_v48 = vsel %vm285_vm3, 0.0, %v283_v45  ;;  %v302_v49 = vmul.f32 %v300_v40, %v283_v45  ;;  %v316_v50 = vmul.f32 %v314_v41, %v283_v45  ;;  %v330_v51 = vmul.f32 %v328_v42, %v283_v45 }
 0x195   : > { %v291_v52 = vmul.f32 %v290_v44, %v286_v48  ;;  %v301_v53 = vmul.f32 %v300_v40, %v286_v48  ;;  %v315_v54 = vmul.f32 %v314_v41, %v286_v48  ;;  %v329_v55 = vmul.f32 %v328_v42, %v286_v48 }
 0x196   : > { %v307_v56 = vrot.slane %v302_v49, 1  ;;  %v321_v60 = vrot.slane %v316_v50, 2  ;;  %v335_v63 = vrot.slane %v330_v51, 3  ;;  %v1109_v45 = vmul.f32 -1.442695, %v1598_v43 }
 0x197   : > { %v296_v57 = vadd.f32 %v295_v47, %v291_v52  ;;  %v306_v58 = vrot.slane %v301_v53, 1  ;;  %v320_v59 = vrot.slane %v315_v54, 2  ;;  %v334_v62 = vrot.slane %v329_v55, 3 }
 0x199   : > { %v308_v61 = vsel %vm305_vm4, %v306_v58, %v307_v56  ;;  %v322_v1 = vsel %vm319_vm5, %v320_v59, %v321_v60  ;;  %v336_v3 = vsel %vm333_vm6, %v334_v62, %v335_v63  ;;  %v1689_v59 = vld [vmem:[%s1958_s2 + $0xa8] sm:$0xff] }
 0x19a   : > { %v310_v0 = vadd.f32 %v308_v61, %v296_v57 }
 0x19c   : > { %v324_v2 = vadd.f32 %v322_v1, %v310_v0 }
 0x19e   : > { %v338_v4 = vadd.f32 %v336_v3, %v324_v2 }
 0x1a0   : > { %v1102_v5 = vmul.f32 -1.442695, %v338_v4 }
 0x1a2   : > { %1315 = vpow2.f32 %v1102_v5 }
 0x1ac   : > { %v1316_v7 = vpop.eup %1315 }
 0x1ad   : > { %v342_v8 = vadd.f32 1.0, %v1316_v7 }
 0x1af   : > { %1317 = vrcp.f32 %v342_v8 }
 0x1b9   : > { %v1318_v10 = vpop.eup %1317 }
 0x1ba   : > { %v1609_v11 = vmul.f32 %v1318_v10, %v338_v4 }
 0x1bc   : > { %1171 = vmatmul.mubr.msk.f32.vlgmr.msra.gmra.mrb[2].mxu1 %vm350_vm2, %v1609_v11  ;;  %1173 = vmatprep.subr.msk.mxu0 %vm350_vm2, %v1609_v11 }
 0x1bd   : > { %1174 = vmatpush3.xpose.msk.msra.mxu0 %vm350_vm2, %v1609_v11 }
 0x1be   : > { %1218 = vmatprep.subr.bf16.mxu0 %v1424_v6 }
 0x1c0   : > { %1176 = vmatmul.mubr.msk.f32.vlgmr.msra.gmra.mrb[0].mxu0 %vm350_vm2, %v187_v12 }
 0x1c1   : > { %1178 = vmatprep.mubr.msk.f32.mxu0 %vm350_vm2, %v188_v13 }
 0x1c4   : > { %1179 = vmatmul.mubr.msk.f32.gmra.mrb[2].mxu0 %vm350_vm2, %v189_v14 }
 0x1c5   : > { %1197 = vmatprep.mubr.msk.f32.mxu0 %vm1425_vm1, %v1426_v9  ;;  %v1430_v9 = vmov 2  }
 0x28f   : > { %v420_v20 = vpop.f32.mrb[2].mxu1 }
 0x290   : > { %v1172_v21 = vpop.f32.mrb[3].mxu1  ;;  %v421_v33 = vadd.f32 %v420_v20, %v349_v32 }
 0x292   : > { %v427_v34 = vand.u32 2147483647, %v421_v33  ;;  %v424_v53 = vmax.f32 %v421_v33, 0.0  ;;  %vm425_vm8 = vcmp.ne.f32.partialorder %v421_v33, %v421_v33 }
 0x293   : > { %v1177_v22 = vpop.f32.mrb[0].mxu0 }
 0x294   : > { %843 = vperm.xlu0 %1287, %v1177_v22   ;;  %559 = vperm.xlu1 %1281, %v1177_v22   ;;  %v520_v23 = vpop.f32.mrb[1].mxu0  ;;  %v428_v40 = vsub.f32 0.0, %v427_v34  ;;  %v180_v34 = vld [vmem:[%s1958_s2 + $0x50] sm:$0xff] }
 0x296   : > { %v429_v41 = vmul.f32 1.442695, %v428_v40  ;;  %v181_v40 = vld [vmem:[%s1958_s2 + $0x58] sm:$0xff] }
 0x297   : > { %v1634_v24 = vpop.f32.mrb[2].mxu0 }
 0x298   : > { %1289 = vset.pattern.permute.xlu0 %v1428_v19  ;;  %1282 = vset.pattern.permute.xlu1 %v1429_v25  ;;  %v1637_v26 = vpop.f32.mrb[3].mxu0  ;;  %1319 = vpow2.f32 %v429_v41 }
 0x299   : > { %608 = vperm.xlu1 %1282, %v1177_v22   ;;  %554 = vperm.xlu0 %1289, %v520_v23  }
 0x29d   : > { %1283 = vset.pattern.permute.xlu1 %v1430_v9  ;;  %1296 = vset.pattern.permute.xlu0 %v1431_v27 }
 0x29e   : > { %655 = vperm.xlu1 %1283, %v1177_v22   ;;  %886 = vperm.xlu0 %1296, %v520_v23  }
 0x2a2   : > { %1284 = vset.pattern.permute.xlu1 %v1432_v28  ;;  %1299 = vset.pattern.permute.xlu0 %v1430_v9  ;;  %v1320_v42 = vpop.eup %1319 }
 0x2a3   : > { %702 = vperm.xlu1 %1284, %v1177_v22   ;;  %671 = vperm.xlu0 %1299, %v1634_v24   ;;  %v431_v44 = vadd.f32 1.0, %v1320_v42  ;;  %v434_v46 = vmul.f32 -0.5, %v1320_v42  ;;  %v437_v49 = vand.u32 2147483647, %v1320_v42 }
 0x2a5   : > { %1321 = vlog2.f32 %v431_v44  ;;  %v435_v48 = vadd.f32 1.0, %v434_v46  ;;  %vm438_vm7 = vcmp.lt.f32.partialorder %v437_v49, 0.0004427343 }
 0x2a6   : > { %1323 = vpow2.f32 %v1109_v45 }
 0x2a7   : > { %1285 = vset.pattern.permute.xlu1 %v1433_v29  ;;  %1301 = vset.pattern.permute.xlu0 %v1433_v29  ;;  %v436_v51 = vmul.f32 %v1320_v42, %v435_v48 }
 0x2a8   : > { %749 = vperm.xlu1 %1285, %v1177_v22   ;;  %765 = vperm.xlu0 %1301, %v1634_v24  }
 0x2ac   : > { %1286 = vset.pattern.permute.xlu1 %v1434_v30  ;;  %1305 = vset.pattern.permute.xlu0 %v1429_v25 }
 0x2ad   : > { %796 = vperm.xlu1 %1286, %v1177_v22   ;;  %620 = vperm.xlu0 %1305, %v1637_v26  }
 0x2af   : > { %v1322_v47 = vpop.eup %1321 }
 0x2b0   : > { %v433_v50 = vmul.f32 0.6931472, %v1322_v47  ;;  %v1324_v55 = vpop.eup %1323  ;;  %v1222_v47 = vpack.c.bf16 %v181_v40, %v180_v34 }
 0x2b1   : > { %1288 = vset.pattern.permute.xlu1 %v1431_v27  ;;  %1310 = vset.pattern.permute.xlu0 %v1427_v18  ;;  %v939_v56 = vadd.f32 1.0, %v1324_v55 }
 0x2b2   : > { %890 = vperm.xlu1 %1288, %v1177_v22   ;;  %855 = vperm.xlu0 %1310, %v1637_v26   ;;  %v439_v52 = vsel %vm438_vm7, %v436_v51, %v433_v50  ;;  %v183_v51 = vld [vmem:[%s1958_s2 + $0x68] sm:$0xff] }
 0x2b3   : > { %v440_v54 = vadd.f32 %v439_v52, %v424_v53  ;;  %1325 = vrcp.f32 %v939_v56 }
 0x2b5   : > { %v1679_v57 = vsel %vm425_vm8, %v421_v33, %v440_v54 }
 0x2b6   : > { %1290 = vset.pattern.permute.xlu1 %v1429_v25  ;;  %1312 = vset.pattern.permute.xlu0 %v1431_v27  ;;  %v1684_v58 = vrot.slane %v1679_v57, %v1587_v38  ;;  %v1698_v61 = vrot.slane %v1679_v57, %v1578_v35  ;;  %v1706_v1 = vrot.slane %v1679_v57, %v1581_v36 }
 0x2b7   : > { %604 = vperm.xlu1 %1290, %v520_v23   ;;  %906 = vperm.xlu0 %1312, %v1634_v24   ;;  %v1714_v5 = vrot.slane %v1679_v57, %v1584_v37  ;;  %v1718_v7 = vmul.f32 %v1679_v57, %v1609_v11  ;;  %v1735_v22 = vrot.slane %v1679_v57, %v1654_v31 }
 0x2b8   : > { %v545_v60 = vmul.f32 %v1684_v58, %v1689_v59  ;;  %v596_v63 = vmul.f32 %v1698_v61, %v1689_v59  ;;  %v643_v4 = vmul.f32 %v1706_v1, %v1689_v59  ;;  %v1778_v50 = vrot.slane %v1679_v57, %v1534_v16 }
 0x2b9   : > { %v690_v10 = vmul.f32 %v1714_v5, %v1689_v59  ;;  %v1728_v13 = vrot.slane %v1718_v7, %v1587_v38  ;;  %v1741_v38 = vrot.slane %v1718_v7, %v1578_v35  ;;  %v178_v35 = vld [vmem:[%s1958_s2 + $0x40] sm:$0xff]  ;;  %v1770_v42 = vrot.slane %v1718_v7, %v1581_v36 }
 0x2ba   : > { %v548_v62 = vmul.f32 1.442695, %v545_v60  ;;  %v599_v3 = vmul.f32 1.442695, %v596_v63  ;;  %v646_v8 = vmul.f32 1.442695, %v643_v4  ;;  %v1791_v54 = vrot.slane %v1718_v7, %v1584_v37 }
 0x2bb   : > { %1291 = vset.pattern.permute.xlu1 %v1430_v9  ;;  %v182_v36 = vld [vmem:[%s1958_s2 + $0x60] sm:$0xff]  ;;  %v184_v63 = vld [vmem:[%s1958_s2 + $0x70] sm:$0xff]  ;;  %v185_v37 = vld [vmem:[%s1958_s2 + $0x78] sm:$0xff] }
 0x2bc   : > { %651 = vperm.xlu1 %1291, %v520_v23   ;;  %1327 = vpow2.f32 %v548_v62  ;;  %v1225_v55 = vpack.c.bf16 %v183_v51, %v182_v36  ;;  %v878_v62 = vmul.f32 %v1778_v50, %v1689_v59 }
 0x2bd   : > { %v1326_v0 = vpop.eup %1325  ;;  %1329 = vpow2.f32 %v599_v3  ;;  %v1228_v3 = vpack.c.bf16 %v185_v37, %v184_v63 }
 0x2be   : > { %v942_v2 = vmul.f32 %v1326_v0, %v1598_v43  ;;  %v1724_v43 = vrot.slane %v1679_v57, %v1590_v39  ;;  %1331 = vpow2.f32 %v646_v8  ;;  %v881_v8 = vmul.f32 1.442695, %v878_v62 }
 0x2c0   : > { %1292 = vset.pattern.permute.xlu1 %v1432_v28  ;;  %v737_v21 = vmul.f32 %v1724_v43, %v1689_v59 }
 0x2c1   : > { %698 = vperm.xlu1 %1292, %v520_v23  }
 0x2c5   : > { %1293 = vset.pattern.permute.xlu1 %v1433_v29 }
 0x2c6   : > { %745 = vperm.xlu1 %1293, %v520_v23   ;;  %v1328_v12 = vpop.eup %1327 }
 0x2ca   : > { %1294 = vset.pattern.permute.xlu1 %v1434_v30 }
 0x2cb   : > { %792 = vperm.xlu1 %1294, %v520_v23  }
 0x2cf   : > { %1295 = vset.pattern.permute.xlu1 %v1427_v18 }
 0x2d0   : > { %839 = vperm.xlu1 %1295, %v520_v23  }
 0x2d4   : > { %1297 = vset.pattern.permute.xlu1 %v1428_v19 }
 0x2d5   : > { %577 = vperm.xlu1 %1297, %v1634_v24  }
 0x2d9   : > { %1298 = vset.pattern.permute.xlu1 %v1429_v25  ;;  %v1744_v25 = vsub.s32 6, %v1531_v15  ;;  %v179_v15 = vld [vmem:[%s1958_s2 + $0x48] sm:$0xff] }
 0x2da   : > { %624 = vperm.xlu1 %1298, %v1634_v24   ;;  %v1219_v33 = vpack.c.bf16 %v179_v15, %v178_v35 }
 0x2dc   : > { %1220 = vmatpush3.bf16.msra.mxu0 %v1219_v33 }
 0x2dd   : > { %1221 = vmatprep.subr.bf16.mxu0 %v1424_v6 }
 0x2de   : > { %1300 = vset.pattern.permute.xlu1 %v1432_v28 }
 0x2df   : > { %718 = vperm.xlu1 %1300, %v1634_v24  }
 0x2e0   : > { %1223 = vmatpush3.bf16.msra.mxu0 %v1222_v47 }
 0x2e1   : > { %1224 = vmatprep.subr.bf16.mxu0 %v1424_v6 }
 0x2e3   : > { %1302 = vset.pattern.permute.xlu1 %v1434_v30 }
 0x2e4   : > { %812 = vperm.xlu1 %1302, %v1634_v24   ;;  %1226 = vmatpush3.bf16.msra.mxu0 %v1225_v55 }
 0x2e5   : > { %1227 = vmatprep.subr.bf16.mxu0 %v1424_v6 }
 0x2e8   : > { %1303 = vset.pattern.permute.xlu1 %v1427_v18  ;;  %v693_v18 = vmul.f32 1.442695, %v690_v10  ;;  %1229 = vmatpush3.bf16.msra.mxu0 %v1228_v3 }
 0x2e9   : > { %859 = vperm.xlu1 %1303, %v1634_v24   ;;  %v1330_v24 = vpop.eup %1329 }
 0x2ea   : > { %1333 = vpow2.f32 %v693_v18  ;;  %v1332_v41 = vpop.eup %1331 }
 0x2ed   : > { %1304 = vset.pattern.permute.xlu1 %v1428_v19  ;;  %v551_v19 = vmul.f32 0.0, %v1328_v12 }
 0x2ee   : > { %572 = vperm.xlu1 %1304, %v1637_v26  }
 0x2f2   : > { %1306 = vset.pattern.permute.xlu1 %v1430_v9 }
 0x2f3   : > { %667 = vperm.xlu1 %1306, %v1637_v26  }
 0x2f4   : > { %v1334_v53 = vpop.eup %1333 }
 0x2f7   : > { %1307 = vset.pattern.permute.xlu1 %v1432_v28  ;;  %v784_v28 = vmul.f32 %v1735_v22, %v1689_v59 }
 0x2f8   : > { %714 = vperm.xlu1 %1307, %v1637_v26  }
 0x2f9   : > { %v787_v44 = vmul.f32 1.442695, %v784_v28 }
 0x2fc   : > { %1308 = vset.pattern.permute.xlu1 %v1433_v29 }
 0x2fd   : > { %761 = vperm.xlu1 %1308, %v1637_v26  }
 0x301   : > { %1309 = vset.pattern.permute.xlu1 %v1434_v30  ;;  %v1752_v30 = vrot.slane %v1679_v57, %v1744_v25 }
 0x302   : > { %808 = vperm.xlu1 %1309, %v1637_v26  }
 0x303   : > { %v831_v48 = vmul.f32 %v1752_v30, %v1689_v59  ;;  %v1808_v59 = vrot.slane %v1718_v7, %v1590_v39  ;;  %v1822_v39 = vld [vmem:[%s1958_s2 + $0xa0] sm:$0xff] }
 0x305   : > { %v834_v56 = vmul.f32 1.442695, %v831_v48  ;;  %v642_v48 = vmul.f32 %v1706_v1, %v1822_v39 }
 0x306   : > { %1311 = vset.pattern.permute.xlu1 %v1431_v27  ;;  %v740_v27 = vmul.f32 1.442695, %v737_v21 }
 0x307   : > { %902 = vperm.xlu1 %1311, %v1637_v26  }
 0x308   : > { %1335 = vpow2.f32 %v740_v27  ;;  %v544_v27 = vmul.f32 %v1684_v58, %v1822_v39 }
 0x309   : > { %1337 = vpow2.f32 %v787_v44 }
 0x30a   : > { %1339 = vpow2.f32 %v834_v56  ;;  %v546_v40 = vmul.f32 1.442695, %v544_v27 }
 0x30b   : > { %944 = vrot.lane.b32.xlu1 %v942_v2, %s1435_s4  ;;  %1341 = vpow2.f32 %v881_v8 }
 0x30c   : > { %1343 = vpow2.f32 %v546_v40 }
 0x312   : > { %v1336_v4 = vpop.eup %1335 }
 0x313   : > { %v560_v14 = vpop.permute.xlu1 %559 }
 0x314   : > { %v567_v20 = vmul.f32 %v1728_v13, %v560_v14 }
 0x316   : > { %v1737_v23 = vadd.f32 %v567_v20, %v551_v19  ;;  %v1338_v19 = vpop.eup %1337  ;;  %v1817_v20 = vrot.slane %v1718_v7, %v1654_v31 }
 0x317   : > { %v1340_v28 = vpop.eup %1339 }
 0x318   : > { %v609_v26 = vpop.permute.xlu1 %608  ;;  %v602_v9 = vmul.f32 %v1330_v24, %v1737_v23  ;;  %v1342_v44 = vpop.eup %1341 }
 0x319   : > { %v616_v29 = vmul.f32 %v1741_v38, %v609_v26  ;;  %v844_v26 = vpop.permute.xlu0 %843  ;;  %v1344_v51 = vpop.eup %1343 }
 0x31a   : > { %v550_v56 = vmul.f32 0.0, %v1344_v51 }
 0x31b   : > { %v1760_v32 = vadd.f32 %v616_v29, %v602_v9  ;;  %v1828_v9 = vrot.slane %v1718_v7, %v1744_v25  ;;  %v1836_v29 = vrot.slane %v1718_v7, %v1534_v16 }
 0x31d   : > { %v656_v45 = vpop.permute.xlu1 %655  ;;  %v649_v46 = vmul.f32 %v1332_v41, %v1760_v32  ;;  %v851_v35 = vmul.f32 %v1828_v9, %v844_v26 }
 0x31e   : > { %v663_v49 = vmul.f32 %v1770_v42, %v656_v45 }
 0x320   : > { %v1787_v52 = vadd.f32 %v663_v49, %v649_v46  ;;  %v595_v46 = vmul.f32 %v1698_v61, %v1822_v39  ;;  %v555_v49 = vpop.permute.xlu0 %554 }
 0x321   : > { %v566_v55 = vmul.f32 %v1728_v13, %v555_v49  ;;  %v877_v49 = vmul.f32 %v1778_v50, %v1822_v39 }
 0x322   : > { %v703_v57 = vpop.permute.xlu1 %702  ;;  %v696_v60 = vmul.f32 %v1334_v53, %v1787_v52  ;;  %v597_v7 = vmul.f32 1.442695, %v595_v46  ;;  %v644_v53 = vmul.f32 1.442695, %v642_v48 }
 0x323   : > { %v710_v0 = vmul.f32 %v1791_v54, %v703_v57  ;;  %v689_v57 = vmul.f32 %v1714_v5, %v1822_v39 }
 0x324   : > { %1345 = vpow2.f32 %v597_v7 }
 0x325   : > { %v1804_v2 = vadd.f32 %v710_v0, %v696_v60  ;;  %1347 = vpow2.f32 %v644_v53  ;;  %v568_v60 = vadd.f32 %v566_v55, %v550_v56  ;;  %v691_v37 = vmul.f32 1.442695, %v689_v57 }
 0x327   : > { %v750_v10 = vpop.permute.xlu1 %749  ;;  %v743_v12 = vmul.f32 %v1336_v4, %v1804_v2  ;;  %1349 = vpow2.f32 %v691_v37  ;;  %v736_v4 = vmul.f32 %v1724_v43, %v1822_v39  ;;  %v830_v43 = vmul.f32 %v1752_v30, %v1822_v39 }
 0x328   : > { %v757_v14 = vmul.f32 %v1808_v59, %v750_v10 }
 0x32a   : > { %v1813_v18 = vadd.f32 %v757_v14, %v743_v12  ;;  %v738_v14 = vmul.f32 1.442695, %v736_v4 }
 0x32c   : > { %v797_v6 = vpop.permute.xlu1 %796  ;;  %v790_v21 = vmul.f32 %v1338_v19, %v1813_v18  ;;  %1351 = vpow2.f32 %v738_v14 }
 0x32d   : > { %v804_v24 = vmul.f32 %v1817_v20, %v797_v6 }
 0x32e   : > { %v1346_v63 = vpop.eup %1345 }
 0x32f   : > { %v1832_v31 = vadd.f32 %v804_v24, %v790_v21  ;;  %v601_v0 = vmul.f32 %v1346_v63, %v568_v60  ;;  %v1348_v8 = vpop.eup %1347  ;;  %v879_v63 = vmul.f32 1.442695, %v877_v49 }
 0x331   : > { %v837_v15 = vmul.f32 %v1340_v28, %v1832_v31  ;;  %v891_v33 = vpop.permute.xlu1 %890  ;;  %v1350_v6 = vpop.eup %1349 }
 0x332   : > { %v898_v34 = vmul.f32 %v1836_v29, %v891_v33 }
 0x333   : > { %v1841_v41 = vadd.f32 %v851_v35, %v837_v15  ;;  %v1862_v15 = vpop.permute.xlu0 %886 }
 0x335   : > { %v884_v58 = vmul.f32 %v1342_v44, %v1841_v41 }
 0x336   : > { %v605_v45 = vpop.permute.xlu1 %604 }
 0x337   : > { %v1846_v16 = vadd.f32 %v898_v34, %v884_v58  ;;  %v615_v62 = vmul.f32 %v1741_v38, %v605_v45  ;;  %v783_v38 = vmul.f32 %v1735_v22, %v1822_v39  ;;  %v832_v22 = vmul.f32 1.442695, %v830_v43  ;;  %v672_v58 = vpop.permute.xlu0 %671 }
 0x339   : > { %v617_v3 = vadd.f32 %v615_v62, %v601_v0  ;;  %v785_v26 = vmul.f32 1.442695, %v783_v38 }
 0x33b   : > { %v652_v47 = vpop.permute.xlu1 %651  ;;  %v648_v10 = vmul.f32 %v1348_v8, %v617_v3  ;;  %1353 = vpow2.f32 %v785_v26 }
 0x33c   : > { %v662_v12 = vmul.f32 %v1770_v42, %v652_v47  ;;  %v1352_v42 = vpop.eup %1351  ;;  %1355 = vpow2.f32 %v832_v22  ;;  %v766_v47 = vpop.permute.xlu0 %765 }
 0x33d   : > { %1357 = vpow2.f32 %v879_v63  ;;  %v769_v26 = vmul.f32 %v766_v47, %v1813_v18 }
 0x33e   : > { %v664_v5 = vadd.f32 %v662_v12, %v648_v10 }
 0x340   : > { %v699_v36 = vpop.permute.xlu1 %698  ;;  %v695_v21 = vmul.f32 %v1350_v6, %v664_v5  ;;  %v621_v55 = vpop.permute.xlu0 %620 }
 0x341   : > { %v709_v24 = vmul.f32 %v1791_v54, %v699_v36 }
 0x343   : > { %v711_v28 = vadd.f32 %v709_v24, %v695_v21 }
 0x345   : > { %v746_v61 = vpop.permute.xlu1 %745  ;;  %v742_v33 = vmul.f32 %v1352_v42, %v711_v28  ;;  %v1354_v54 = vpop.eup %1353 }
 0x346   : > { %v756_v34 = vmul.f32 %v1808_v59, %v746_v61  ;;  %v1356_v51 = vpop.eup %1355  ;;  %v627_v61 = vmul.f32 %v621_v55, %v617_v3 }
 0x347   : > { %v1358_v22 = vpop.eup %1357 }
 0x348   : > { %v758_v44 = vadd.f32 %v756_v34, %v742_v33 }
 0x34a   : > { %v793_v1 = vpop.permute.xlu1 %792  ;;  %v789_v45 = vmul.f32 %v1354_v54, %v758_v44 }
 0x34b   : > { %v803_v46 = vmul.f32 %v1817_v20, %v793_v1  ;;  %v675_v20 = vmul.f32 %v672_v58, %v1787_v52  ;;  %v629_v1 = vsel %vm350_vm2, %v627_v61, 0.0  ;;  %v771_v58 = vsel %vm350_vm2, %v769_v26, 0.0 }
 0x34d   : > { %v1866_v48 = vadd.f32 %v803_v46, %v789_v45 }
 0x34f   : > { %v840_v13 = vpop.permute.xlu1 %839  ;;  %v836_v56 = vmul.f32 %v1356_v51, %v1866_v48 }
 0x350   : > { %v850_v57 = vmul.f32 %v1828_v9, %v840_v13  ;;  %v856_v13 = vpop.permute.xlu0 %855 }
 0x354   : > { %v578_v19 = vpop.permute.xlu1 %577  ;;  %v907_v46 = vpop.permute.xlu0 %906 }
 0x355   : > { %v581_v59 = vmul.f32 %v578_v19, %v1737_v23  ;;  %v852_v23 = vadd.f32 %v850_v57, %v836_v56  ;;  %v897_v56 = vmul.f32 %v1836_v29, %v1862_v15  ;;  %v910_v57 = vmul.f32 %v907_v46, %v1846_v16 }
 0x357   : > { %v583_v50 = vsel %vm350_vm2, %v581_v59, 0.0  ;;  %v862_v12 = vmul.f32 %v856_v13, %v852_v23  ;;  %v883_v51 = vmul.f32 %v1358_v22, %v852_v23  ;;  %v912_v29 = vsel %vm350_vm2, %v910_v57, 0.0 }
 0x358   : > { %v933_v22 = vrot.slane %v1539_v17, %v1744_v25  ;;  %v1359_v25 = vld [vmem:[%s1510_s28] sm:$0xff]  ;;  %s1436_s28 = smov [#allocation2]  }
 0x359   : > { %v625_v27 = vpop.permute.xlu1 %624  ;;  %s1364_s24 = sshll.u32 %s1436_s28, 4  ;;  %s1365_s24 = int_to_ptr.vmem [resolvable:$false] %s1364_s24 }
 0x35a   : > { %v628_v53 = vmul.f32 %v625_v27, %v1760_v32  ;;  %v677_v32 = vsel %vm350_vm2, %v675_v20, 0.0  ;;  %s1366_s25 = scalar_lea.vmem %s1365_s24, 256  ;;  %p1367_p0 = scmp.lt.s32.totalorder %s1915_s10, %s1365_s24 }
 0x35b   : > { %p1368_p1 = scmp.lt.s32.totalorder %s1366_s25, %s1360_s16 }
 0x35c   : > { %v630_v39 = vsel %vm350_vm2, %v628_v53, 0.0 }
 0x35d   : > { %v631_v52 = vadd.f32 %v630_v39, %v629_v1  ;;  %p1369_p2 = por %p1368_p1, %p1367_p0 }
 0x35e   : > { %v719_v35 = vpop.permute.xlu1 %718 }
 0x35f   : > { %v722_v3 = vmul.f32 %v719_v35, %v1804_v2  ;;  %v632_v38 = vrot.slane %v631_v52, 4  ;;  %v864_v2 = vsel %vm350_vm2, %v862_v12, 0.0  ;;  %p1370_p3 = pnand %p1369_p2, %p1363_p13 }
 0x361   : > { %v724_v6 = vsel %vm350_vm2, %v722_v3, 0.0 }
 0x363   : > { %v813_v40 = vpop.permute.xlu1 %812 }
 0x368   : > { %v860_v7 = vpop.permute.xlu1 %859 }
 0x369   : > { %v863_v4 = vmul.f32 %v860_v7, %v1841_v41  ;;  %v816_v7 = vmul.f32 %v813_v40, %v1832_v31 }
 0x36b   : > { %v865_v21 = vsel %vm350_vm2, %v863_v4, 0.0  ;;  %v818_v20 = vsel %vm350_vm2, %v816_v7, 0.0 }
 0x36c   : > { %v866_v35 = vadd.f32 %v865_v21, %v864_v2 }
 0x36d   : > { %v573_v30 = vpop.permute.xlu1 %572 }
 0x36e   : > { %v580_v36 = vmul.f32 %v573_v30, %v568_v60  ;;  %v867_v30 = vrot.slane %v866_v35, 4 }
 0x370   : > { %v582_v62 = vsel %vm350_vm2, %v580_v36, 0.0 }
 0x371   : > { %v584_v0 = vadd.f32 %v583_v50, %v582_v62  ;;  %v868_v62 = vadd.f32 %v867_v30, %v866_v35  ;;  %v899_v50 = vadd.f32 %v897_v56, %v883_v51 }
 0x372   : > { %v668_v37 = vpop.permute.xlu1 %667 }
 0x373   : > { %v674_v60 = vmul.f32 %v668_v37, %v664_v5  ;;  %v585_v14 = vrot.slane %v584_v0, 4  ;;  %v869_v1 = vrot.slane %v868_v62, 2 }
 0x375   : > { %v676_v9 = vsel %vm350_vm2, %v674_v60, 0.0  ;;  %v586_v41 = vadd.f32 %v585_v14, %v584_v0 }
 0x376   : > { %v678_v8 = vadd.f32 %v677_v32, %v676_v9 }
 0x377   : > { %v715_v10 = vpop.permute.xlu1 %714  ;;  %v587_v18 = vrot.slane %v586_v41, 2 }
 0x378   : > { %v721_v5 = vmul.f32 %v715_v10, %v711_v28  ;;  %v679_v19 = vrot.slane %v678_v8, 4  ;;  %v633_v28 = vadd.f32 %v632_v38, %v631_v52 }
 0x379   : > { %v588_v61 = vadd.f32 %v587_v18, %v586_v41  ;;  %v934_v18 = vmul.f32 %v933_v22, %v1609_v11 }
 0x37a   : > { %v723_v24 = vsel %vm350_vm2, %v721_v5, 0.0  ;;  %v680_v42 = vadd.f32 %v679_v19, %v678_v8  ;;  %v634_v59 = vrot.slane %v633_v28, 2  ;;  %v870_v19 = vadd.f32 %v869_v1, %v868_v62 }
 0x37b   : > { %v725_v27 = vadd.f32 %v724_v6, %v723_v24  ;;  %v589_v15 = vrot.slane %v588_v61, 1 }
 0x37c   : > { %v762_v43 = vpop.permute.xlu1 %761  ;;  %v681_v49 = vrot.slane %v680_v42, 2  ;;  %v635_v39 = vadd.f32 %v634_v59, %v633_v28  ;;  %v871_v35 = vrot.slane %v870_v19, 1 }
 0x37d   : > { %v726_v33 = vrot.slane %v725_v27, 4  ;;  %v768_v34 = vmul.f32 %v762_v43, %v758_v44  ;;  %v590_v14 = vadd.f32 %v589_v15, %v588_v61 }
 0x37e   : > { %v682_v63 = vadd.f32 %v681_v49, %v680_v42  ;;  %v636_v4 = vrot.slane %v635_v39, 1  ;;  %v872_v46 = vadd.f32 %v871_v35, %v870_v19 }
 0x37f   : > { %v727_v54 = vadd.f32 %v726_v33, %v725_v27  ;;  %v770_v45 = vsel %vm350_vm2, %v768_v34, 0.0 }
 0x380   : > { %v772_v47 = vadd.f32 %v771_v58, %v770_v45  ;;  %v683_v9 = vrot.slane %v682_v63, 1  ;;  %v637_v21 = vadd.f32 %v636_v4, %v635_v39 }
 0x381   : > { %v809_v36 = vpop.permute.xlu1 %808  ;;  %v728_v53 = vrot.slane %v727_v54, 2 }
 0x382   : > { %v773_v55 = vrot.slane %v772_v47, 4  ;;  %v815_v44 = vmul.f32 %v809_v36, %v1866_v48  ;;  %v684_v38 = vadd.f32 %v683_v9, %v682_v63  ;;  %v921_v41 = vsel %vm920_vm9, %v590_v14, %v637_v21 }
 0x383   : > { %v729_v60 = vadd.f32 %v728_v53, %v727_v54 }
 0x384   : > { %v774_v31 = vadd.f32 %v773_v55, %v772_v47  ;;  %v817_v40 = vsel %vm350_vm2, %v815_v44, 0.0  ;;  %v923_v42 = vsel %vm922_vm10, %v921_v41, %v684_v38 }
 0x385   : > { %v819_v37 = vadd.f32 %v818_v20, %v817_v40  ;;  %v730_v8 = vrot.slane %v729_v60, 1 }
 0x386   : > { %v775_v23 = vrot.slane %v774_v31, 2  ;;  %v903_v0 = vpop.permute.xlu1 %902 }
 0x387   : > { %v820_v48 = vrot.slane %v819_v37, 4  ;;  %v909_v32 = vmul.f32 %v903_v0, %v899_v50  ;;  %v731_v24 = vadd.f32 %v730_v8, %v729_v60 }
 0x388   : > { %v776_v16 = vadd.f32 %v775_v23, %v774_v31 }
 0x389   : > { %v821_v52 = vadd.f32 %v820_v48, %v819_v37  ;;  %v911_v3 = vsel %vm350_vm2, %v909_v32, 0.0  ;;  %v924_v28 = vsel %vm285_vm3, %v923_v42, %v731_v24 }
 0x38a   : > { %v913_v13 = vadd.f32 %v912_v29, %v911_v3  ;;  %v777_v10 = vrot.slane %v776_v16, 1  ;;  %v945_v36 = vpop.permute.xlu1 %944 }
 0x38b   : > { %v822_v12 = vrot.slane %v821_v52, 2 }
 0x38c   : > { %v914_v5 = vrot.slane %v913_v13, 4  ;;  %v778_v27 = vadd.f32 %v777_v10, %v776_v16 }
 0x38d   : > { %v823_v6 = vadd.f32 %v822_v12, %v821_v52 }
 0x38e   : > { %v915_v26 = vadd.f32 %v914_v5, %v913_v13  ;;  %v926_v58 = vsel %vm925_vm11, %v924_v28, %v778_v27 }
 0x38f   : > { %v824_v2 = vrot.slane %v823_v6, 1 }
 0x390   : > { %v916_v43 = vrot.slane %v915_v26, 2 }
 0x391   : > { %v825_v33 = vadd.f32 %v824_v2, %v823_v6 }
 0x392   : > { %v917_v34 = vadd.f32 %v916_v43, %v915_v26 }
 0x393   : > { %v927_v45 = vsel %vm333_vm6, %v926_v58, %v825_v33 }
 0x394   : > { %v918_v54 = vrot.slane %v917_v34, 1  ;;  %v928_v47 = vsel %vm319_vm5, %v927_v45, %v872_v46 }
 0x396   : > { %v919_v7 = vadd.f32 %v918_v54, %v917_v34 }
 0x398   : > { %v929_v30 = vsel %vm305_vm4, %v928_v47, %v919_v7 }
 0x399   : > { %v935_v49 = vadd.f32 %v934_v18, %v929_v30 }
 0x39b   : > { %v947_v51 = vmul.f32 %v945_v36, %v935_v49 }
 0x39d   : > { %1198 = vmatmul.mubr.msk.f32.vlgmr.msra.gmra.mrb[4].mxu0 %vm350_vm2, %v947_v51 }
 0x470   : > { %v1017_v17 = vpop.f32.mrb[4].mxu0 }
 0x471   : > { %v1018_v59 = vadd.f32 %v1359_v25, %v1017_v17  ;;  %v1199_v53 = vpop.f32.mrb[5].mxu0 }
 0x473   : > { %1021 = vst.msk [vmem:[%s161_s9] sm:$0xff] %vm195_vm0, %v1018_v59 }
 0x474   : > { %1373 = shalt.err (!%p1370_p3)
}
 0x475   : > { %s1374_s26 = scalar_lea.hbm %s1913_s19, 128  ;;  %s1378_s30 = scalar_lea.hbm %s1959_s3, 256 }
 0x476   : > { %p1375_p4 = scmp.ne.s32.totalorder %s1913_s19, %s1374_s26  ;;  %p1379_p9 = scmp.lt.u32.totalorder %s1913_s19, %s1959_s3 }
 0x477   : > { %p1380_p10 = scmp.lt.u32.totalorder %s1378_s30, %s1374_s26  ;;  %p1382_p12 = scmp.lt.u32.totalorder %s1374_s26, %s1913_s19 }
 0x478   : > { %p1376_p7 = pnand %p1375_p4, %p1495_p5 }
 0x479   : > { %p1381_p11 = por %p1380_p10, %p1379_p9 }
 0x47a   : > { %p1377_p8 = pneg %p1376_p7 }
 0x47b   : > { %p1383_p13 = por %p1382_p12, %p1381_p11 }
 0x47d   : > { %p1384_p0 = pnand %p1383_p13, %p1377_p8 }
 0x47f   : > { %1387 = shalt.err (!%p1384_p0)
}
 0x480   : > { %1230 = dma.vmem_to_hbm [thread:$0]  (%p1495_p5), %s1915_s10, 128, %s1913_s19, %s1023_s20  }
 0x481 PF: > { %p1236_p1 = scmp.ge.s32.totalorder %s1422_s15, 2  ;;  %s1048_s6 = sand.u32 1, %s1410_s12  }
 0x482   : > { %s1049_s7 = scalar_lea.sflag [#allocation3], %s1048_s6 }
 0x483   : > { %p1233_p2 = pnand %p1236_p1, %p1499_p6 }
 0x485   : > { %1405 = dma.done.wait (!%p1233_p2), %s1049_s7, 128  }
 0x486   : > { %1407 = vsyncadd (!%p1233_p2), %s1049_s7, 4294967168  ;;  %p13_p3 = scmp.ge.s32.totalorder %s1482_s18, 4   ;;  %s1962_s12 = smov %s1414_s13 }
 0x487   : > { %s1963_s13 = smov %s1418_s14  ;;  %s1964_s14 = smov %s1493_s21 }
 0x488   : > { %s1965_s15 = smov %s1482_s18  ;;  %15 = sbr.rel (!%p13_p3) target bundleno = 3 (0x3), region = 67 }
 0x48f   :  { %1054 = vsyncpa [#allocation3], 1 }
 0x490   :  { %1056 = vsyncpa [#allocation3 + $0x1], 1 }

</bundles_post_ra>
